<compile_context>
chip_gen: v7x
topology: tpu7x:2x2x1
jax: 0.10.0
libtpu: 0.0.40
codegen_flags: <defaults>
</compile_context>

<pallas_src>
import functools
import math

import numpy as np
import jax
import jax.numpy as jnp
from jax import lax
from jax.experimental import pallas as pl
from jax.experimental.pallas import tpu as pltpu


def _round_up(x, m):
    return ((x + m - 1) // m) * m


def _cdiv(a, b):
    return (a + b - 1) // b


def make_stft_weights(frame_len, frame_hop, num_fft=None):
    """Deterministic replica of init_kernel(): returns (W_real, W_imag, F), each (F, L)."""
    if num_fft is None:
        fft_size = 2 ** math.ceil(math.log2(frame_len))
    else:
        fft_size = num_fft
    n = np.arange(frame_len, dtype=np.float64)
    # torch.hann_window(frame_len) (periodic) ** 0.5
    win = np.sqrt(0.5 * (1.0 - np.cos(2.0 * np.pi * n / frame_len)))
    S_ = 0.5 * (fft_size * fft_size / frame_hop) ** 0.5
    num_bins = fft_size // 2 + 1
    k = np.arange(num_bins, dtype=np.float64)
    ang = 2.0 * np.pi * np.outer(k, n) / fft_size                       # (F, L)
    w_real = (np.cos(ang) / S_) * win[None, :]
    w_imag = (-np.sin(ang) / S_) * win[None, :]
    return w_real.astype(np.float32), w_imag.astype(np.float32), num_bins


def _build_kernel_weight(w_real, w_imag, num_bins, frame_len, slab, num_slabs):
    """Fused (cos | -sin) weight, 8-padded on bins, split into contraction slabs.

    Returns W3 of shape (num_slabs, 2*F8, slab) with
      W3[s, f,      c] =  cos-part weight at tap l = s*slab + c
      W3[s, F8 + f, c] = -sin-part weight at tap l = s*slab + c
    """
    f_pad = _round_up(num_bins, 8)
    w = np.zeros((2 * f_pad, frame_len), dtype=np.float32)
    w[:num_bins] = w_real
    w[f_pad:f_pad + num_bins] = w_imag
    w3 = w.reshape(2 * f_pad, num_slabs, slab).transpose(1, 0, 2)       # (K, 2*F8, slab)
    return jnp.asarray(np.ascontiguousarray(w3)), f_pad


def _stft_tile_kernel(a_ref, b_ref, w_ref, *out_and_scratch,
                      num_slabs, f_pad, with_phase):
    # a_ref: (1, Tb, slab)   current T-tile of hop-rows (or frames when num_slabs==1)
    # b_ref: (1, 8,  slab)   8-row peek into the next tile (covers frame overlap)
    # w_ref: (K, 2*F8, slab) fused cos/-sin weight slabs
    # outputs: mag (1, F8, Tb) [, phase (1, F8, Tb)] ; scratch: window (Tb+8, slab)
    if with_phase:
        mag_ref, ph_ref, win_ref = out_and_scratch
    else:
        mag_ref, win_ref = out_and_scratch
        ph_ref = None

    t_blk = a_ref.shape[1]

    # Assemble the (Tb + 8, slab) sample window in VMEM.
    win_ref[:t_blk, :] = a_ref[0]
    win_ref[t_blk:, :] = b_ref[0]

    # K accumulated MXU matmuls: (2*F8, slab) . (Tb, slab)^T -> (2*F8, Tb).
    ri = None
    for s in range(num_slabs):
        part = lax.dot_general(
            w_ref[s],
            win_ref[pl.ds(s, t_blk), :],
            dimension_numbers=(((1,), (1,)), ((), ())),
            preferred_element_type=jnp.float32)
        ri = part if ri is None else ri + part

    r = ri[:f_pad, :]
    i = ri[f_pad:, :]
    power = r * r + i * i                       # computed once
    mag_ref[0] = jnp.sqrt(power)                # magnitude
    if with_phase:
        ph_ref[0] = jnp.arctan2(i, r)           # phase


def stft_forward(x, frame_len=32, frame_hop=16, num_fft=None,
                 return_phase=True, max_t_block=512):
    """Pallas implementation of STFT.forward.

    x: (N, S) or (N, 1, S) waveform.
    Returns (magnitude, phase) each (N, F, T) with F = fft//2 + 1, T = (S-L)//hop + 1.
    With return_phase=False, returns magnitude only (skips the arctan2 work).
    """
    if x.ndim == 3:
        x = x[:, 0, :]                                              # (N, 1, S) -> (N, S)
    elif x.ndim != 2:
        raise RuntimeError("Expect 2D/3D tensor, but got {:d}D".format(x.ndim))
    N, S = x.shape
    L, hop = frame_len, frame_hop
    if S < L:
        raise RuntimeError(
            "waveform too short for a single frame: S={} < frame_len={}".format(S, L))
    T = (S - L) // hop + 1                                          # conv1d, no padding

    w_real, w_imag, F = make_stft_weights(L, hop, num_fft=num_fft)

    # Fast path: hop divides the frame and the overlap fits in the 8-row peek block.
    if L % hop == 0 and (L // hop) - 1 <= 8:
        num_slabs = L // hop
        slab = hop
        n_rows = T + num_slabs - 1                                  # hop-rows actually needed
        sig = x.astype(jnp.float32)[:, :n_rows * hop].reshape(N, n_rows, hop)
    else:
        # TODO(synk): generic in-kernel framing when hop does not divide frame_len;
        # fall back to host-side im2col (single-slab contraction, same kernel).
        num_slabs = 1
        slab = L
        n_rows = T
        idx = jnp.arange(T)[:, None] * hop + jnp.arange(L)[None, :]
        sig = x.astype(jnp.float32)[:, idx]                         # (N, T, L)

    w3, f_pad = _build_kernel_weight(w_real, w_imag, F, L, slab, num_slabs)

    # T tiling: lane-dense (multiple of 128).  When N == 1, split T over >= 2 tiles so
    # both v7x TensorCores get work.
    max_t_block = max(128, (int(max_t_block) // 128) * 128)
    t_blk = min(max_t_block, _round_up(T, 128))
    if N == 1 and T > 128 and t_blk > 128:
        t_blk = max(128, _round_up(_cdiv(T, 2), 128))
    n_tt = _cdiv(T, t_blk)
    t_pad = n_tt * t_blk

    rows_pad = t_pad + 8                                            # room for the peek block
    sig = jnp.pad(sig, ((0, 0), (0, rows_pad - n_rows), (0, 0)))

    tb8 = t_blk // 8

    kernel = functools.partial(_stft_tile_kernel, num_slabs=num_slabs,
                               f_pad=f_pad, with_phase=return_phase)

    out_shapes = [jax.ShapeDtypeStruct((N, f_pad, t_pad), jnp.float32)]
    out_specs = [pl.BlockSpec((1, f_pad, t_blk), lambda n, t: (n, 0, t))]
    if return_phase:
        out_shapes.append(jax.ShapeDtypeStruct((N, f_pad, t_pad), jnp.float32))
        out_specs.append(pl.BlockSpec((1, f_pad, t_blk), lambda n, t: (n, 0, t)))

    outs = pl.pallas_call(
        kernel,
        out_shape=tuple(out_shapes),
        grid_spec=pltpu.PrefetchScalarGridSpec(
            num_scalar_prefetch=0,
            grid=(N, n_tt),
            in_specs=[
                # current T-tile of hop-rows
                pl.BlockSpec((1, t_blk, slab), lambda n, t: (n, t, 0)),
                # 8-row peek into the next tile (frame overlap)
                pl.BlockSpec((1, 8, slab), lambda n, t: (n, (t + 1) * tb8, 0)),
                # fused weight, grid-invariant (Pallas skips the re-DMA)
                pl.BlockSpec((num_slabs, 2 * f_pad, slab), lambda n, t: (0, 0, 0)),
            ],
            out_specs=tuple(out_specs),
            scratch_shapes=[pltpu.VMEM((t_blk + 8, slab), jnp.float32)],
        ),
        compiler_params=pltpu.CompilerParams(
            dimension_semantics=("parallel", "parallel")),
    )(sig, sig, w3)

    magnitude = outs[0][:, :F, :T]
    if not return_phase:
        return magnitude
    phase = outs[1][:, :F, :T]
    return magnitude, phase


if __name__ == "__main__":
    key = jax.random.PRNGKey(0)
    N, S = 4, 256                        # batch, waveform length
    frame_len, frame_hop = 32, 16        # small analog of the default 320/160
    x = jax.random.normal(key, (N, 1, S), dtype=jnp.float32)

    magnitude, phase = stft_forward(x, frame_len=frame_len, frame_hop=frame_hop)
    jax.block_until_ready((magnitude, phase))

    fft_size = 2 ** math.ceil(math.log2(frame_len))
    F = fft_size // 2 + 1
    T = (S - frame_len) // frame_hop + 1
    assert magnitude.shape == (N, F, T)
    assert phase.shape == (N, F, T)
    assert bool(jnp.all(jnp.isfinite(magnitude)))
    assert bool(jnp.all(jnp.isfinite(phase)))

    # Pure-JAX reference (explicit im2col + matmul), all f32.
    w_real, w_imag, _ = make_stft_weights(frame_len, frame_hop)
    idx = jnp.arange(T)[:, None] * frame_hop + jnp.arange(frame_len)[None, :]
    frames = x[:, 0, :][:, idx]                                     # (N, T, L)
    r_ref = jnp.einsum("ntl,fl->nft", frames, jnp.asarray(w_real))
    i_ref = jnp.einsum("ntl,fl->nft", frames, jnp.asarray(w_imag))
    m_ref = jnp.sqrt(r_ref * r_ref + i_ref * i_ref)

    assert float(jnp.max(jnp.abs(magnitude - m_ref))) < 1e-3
    # Robust phase check: (m*cos(p), m*sin(p)) must reproduce (r, i).
    assert float(jnp.max(jnp.abs(magnitude * jnp.cos(phase) - r_ref))) < 1e-3
    assert float(jnp.max(jnp.abs(magnitude * jnp.sin(phase) - i_ref))) < 1e-3

    # Magnitude-only fast path (skips arctan2 and the phase output).
    m_only = stft_forward(x, frame_len=frame_len, frame_hop=frame_hop,
                          return_phase=False)
    jax.block_until_ready(m_only)
    assert float(jnp.max(jnp.abs(m_only - magnitude))) < 1e-5

    print("KERNEL_OK")
</pallas_src>

<mosaic_0001>
module attributes {stable_mosaic.version = 11 : i64} {
  func.func @_stft_tile_kernel(%arg0: i32, %arg1: i32, %arg2: memref<1x128x16xf32, #tpu.memory_space<vmem>>, %arg3: memref<1x8x16xf32, #tpu.memory_space<vmem>>, %arg4: memref<2x48x16xf32, #tpu.memory_space<vmem>>, %arg5: memref<1x24x128xf32, #tpu.memory_space<vmem>>, %arg6: memref<1x24x128xf32, #tpu.memory_space<vmem>>, %arg7: memref<136x16xf32, #tpu.memory_space<vmem>>) attributes {dimension_semantics = [#tpu.dimension_semantics<parallel>, #tpu.dimension_semantics<parallel>], iteration_bounds = array<i64: 4, 1>, scalar_prefetch = 0 : i64, scratch_operands = 1 : i64, tpu.core_type = #tpu.core_type<tc>, window_params = [{transform_indices = @transform_0, window_bounds = array<i64: 1, 128, 16>}, {transform_indices = @transform_1, window_bounds = array<i64: 1, 8, 16>}, {pipeline_mode = #tpu.pipeline_mode<synchronous>, transform_indices = @transform_2, window_bounds = array<i64: 2, 48, 16>}, {transform_indices = @transform_3, window_bounds = array<i64: 1, 24, 128>}, {transform_indices = @transform_4, window_bounds = array<i64: 1, 24, 128>}]} {
    %c0 = arith.constant 0 : index
    %c0_0 = arith.constant 0 : index
    %c0_1 = arith.constant 0 : index
    %0 = vector.load %arg2[%c0, %c0_0, %c0_1] : memref<1x128x16xf32, #tpu.memory_space<vmem>>, vector<1x128x16xf32>
    %1 = vector.shape_cast %0 : vector<1x128x16xf32> to vector<128x16xf32>
    %c0_2 = arith.constant 0 : index
    %c0_3 = arith.constant 0 : index
    %2 = vector.load %arg7[%c0_2, %c0_3] : memref<136x16xf32, #tpu.memory_space<vmem>>, vector<128x16xf32>
    tpu.vector_store %arg7[%c0_2, %c0_3], %1 {strides = array<i32>} : memref<136x16xf32, #tpu.memory_space<vmem>>, vector<128x16xf32>,
    %c0_4 = arith.constant 0 : index
    %c0_5 = arith.constant 0 : index
    %c0_6 = arith.constant 0 : index
    %3 = vector.load %arg3[%c0_4, %c0_5, %c0_6] : memref<1x8x16xf32, #tpu.memory_space<vmem>>, vector<1x8x16xf32>
    %4 = vector.shape_cast %3 : vector<1x8x16xf32> to vector<8x16xf32>
    %c128 = arith.constant 128 : index
    %c0_7 = arith.constant 0 : index
    %5 = vector.load %arg7[%c128, %c0_7] : memref<136x16xf32, #tpu.memory_space<vmem>>, vector<8x16xf32>
    tpu.vector_store %arg7[%c128, %c0_7], %4 {strides = array<i32>} : memref<136x16xf32, #tpu.memory_space<vmem>>, vector<8x16xf32>,
    %c0_8 = arith.constant 0 : index
    %c0_9 = arith.constant 0 : index
    %c0_10 = arith.constant 0 : index
    %6 = vector.load %arg4[%c0_8, %c0_9, %c0_10] : memref<2x48x16xf32, #tpu.memory_space<vmem>>, vector<1x48x16xf32>
    %7 = vector.shape_cast %6 : vector<1x48x16xf32> to vector<48x16xf32>
    %c0_11 = arith.constant 0 : index
    %c0_12 = arith.constant 0 : index
    %8 = vector.load %arg7[%c0_11, %c0_12] : memref<136x16xf32, #tpu.memory_space<vmem>>, vector<128x16xf32>
    %cst = arith.constant dense<0.000000e+00> : vector<48x128xf32>
    %9 = tpu.matmul %7, %8, %cst {dimension_numbers = #tpu.dot_dimension_numbers<[1], [1], [0], [0], [0, 0, 1, 0], [], []>} : vector<48x16xf32>, vector<128x16xf32>, vector<48x128xf32> -> vector<48x128xf32>
    %c1 = arith.constant 1 : index
    %c0_13 = arith.constant 0 : index
    %c0_14 = arith.constant 0 : index
    %10 = vector.load %arg4[%c1, %c0_13, %c0_14] : memref<2x48x16xf32, #tpu.memory_space<vmem>>, vector<1x48x16xf32>
    %11 = vector.shape_cast %10 : vector<1x48x16xf32> to vector<48x16xf32>
    %c1_15 = arith.constant 1 : index
    %c0_16 = arith.constant 0 : index
    %12 = vector.load %arg7[%c1_15, %c0_16] : memref<136x16xf32, #tpu.memory_space<vmem>>, vector<128x16xf32>
    %cst_17 = arith.constant dense<0.000000e+00> : vector<48x128xf32>
    %13 = tpu.matmul %11, %12, %cst_17 {dimension_numbers = #tpu.dot_dimension_numbers<[1], [1], [0], [0], [0, 0, 1, 0], [], []>} : vector<48x16xf32>, vector<128x16xf32>, vector<48x128xf32> -> vector<48x128xf32>
    %14 = arith.addf %9, %13 : vector<48x128xf32>
    %15 = vector.extract_strided_slice %14 {offsets = [0, 0], sizes = [24, 128], strides = [1, 1]} : vector<48x128xf32> to vector<24x128xf32>
    %16 = vector.extract_strided_slice %14 {offsets = [24, 0], sizes = [24, 128], strides = [1, 1]} : vector<48x128xf32> to vector<24x128xf32>
    %17 = arith.mulf %15, %15 : vector<24x128xf32>
    %18 = arith.mulf %16, %16 : vector<24x128xf32>
    %19 = arith.addf %17, %18 : vector<24x128xf32>
    %20 = math.sqrt %19 : vector<24x128xf32>
    %c0_18 = arith.constant 0 : index
    %c0_19 = arith.constant 0 : index
    %c0_20 = arith.constant 0 : index
    %21 = vector.load %arg5[%c0_18, %c0_19, %c0_20] : memref<1x24x128xf32, #tpu.memory_space<vmem>>, vector<1x24x128xf32>
    %22 = vector.shape_cast %21 : vector<1x24x128xf32> to vector<24x128xf32>
    %23 = vector.shape_cast %20 : vector<24x128xf32> to vector<1x24x128xf32>
    tpu.vector_store %arg5[%c0_18, %c0_19, %c0_20], %23 {strides = array<i32>} : memref<1x24x128xf32, #tpu.memory_space<vmem>>, vector<1x24x128xf32>,
    %24 = math.atan2 %16, %15 : vector<24x128xf32>
    %c0_21 = arith.constant 0 : index
    %c0_22 = arith.constant 0 : index
    %c0_23 = arith.constant 0 : index
    %25 = vector.load %arg6[%c0_21, %c0_22, %c0_23] : memref<1x24x128xf32, #tpu.memory_space<vmem>>, vector<1x24x128xf32>
    %26 = vector.shape_cast %25 : vector<1x24x128xf32> to vector<24x128xf32>
    %27 = vector.shape_cast %24 : vector<24x128xf32> to vector<1x24x128xf32>
    tpu.vector_store %arg6[%c0_21, %c0_22, %c0_23], %27 {strides = array<i32>} : memref<1x24x128xf32, #tpu.memory_space<vmem>>, vector<1x24x128xf32>,
    return
  }
  func.func @transform_0(%arg0: i32, %arg1: i32) -> (i32, i32, i32) {
    %c0_i32 = arith.constant 0 : i32
    %c0_i32_0 = arith.constant 0 : i32
    return %arg0, %arg1, %c0_i32 : i32, i32, i32
  }
  func.func @transform_1(%arg0: i32, %arg1: i32) -> (i32, i32, i32) {
    %c1_i32 = arith.constant 1 : i32
    %0 = arith.addi %arg1, %c1_i32 : i32
    %c16_i32 = arith.constant 16 : i32
    %1 = arith.muli %0, %c16_i32 : i32
    %c0_i32 = arith.constant 0 : i32
    %c0_i32_0 = arith.constant 0 : i32
    return %arg0, %1, %c0_i32 : i32, i32, i32
  }
  func.func @transform_2(%arg0: i32, %arg1: i32) -> (i32, i32, i32) {
    %c0_i32 = arith.constant 0 : i32
    %c0_i32_0 = arith.constant 0 : i32
    %c0_i32_1 = arith.constant 0 : i32
    %c0_i32_2 = arith.constant 0 : i32
    return %c0_i32, %c0_i32_0, %c0_i32_1 : i32, i32, i32
  }
  func.func @transform_3(%arg0: i32, %arg1: i32) -> (i32, i32, i32) {
    %c0_i32 = arith.constant 0 : i32
    %c0_i32_0 = arith.constant 0 : i32
    return %arg0, %c0_i32, %arg1 : i32, i32, i32
  }
  func.func @transform_4(%arg0: i32, %arg1: i32) -> (i32, i32, i32) {
    %c0_i32 = arith.constant 0 : i32
    %c0_i32_0 = arith.constant 0 : i32
    return %arg0, %c0_i32, %arg1 : i32, i32, i32
  }
}

</mosaic_0001>

<bundles_post_ra>
// kernel: tpu_custom_call.1
= control target key start
LH: loop header
LB: loop body
LE: loop exit
PB: predicated region body
PF: predicated region fallthrough
CT: control target
= control target key end

     0   :  { %10 = vsyncpa [#allocation4], 0  ;;  %s2081_s0 = inlined_call_operand.vmem [shape: f32[4,136,16], index: 0, kind: input, shape index: {}]   ;;  %s2082_s1 = inlined_call_operand.vmem [shape: f32[4,136,16], index: 1, kind: input, shape index: {}]   ;;  %s2083_s2 = inlined_call_operand.vmem [shape: f32[2,48,16], index: 2, kind: input, shape index: {}]   ;;  %s2084_s3 = inlined_call_operand.hbm [shape: f32[4,24,128], index: 3, kind: output, shape index: {0}]   ;;  %s2085_s4 = inlined_call_operand.hbm [shape: f32[4,24,128], index: 4, kind: output, shape index: {1}]  }
   0x1   :  { %12 = vsyncpa [#allocation4 + $0x1], 0 }
   0x2   :  { %13 = vsyncpa [#allocation6], 0 }
   0x3   :  { %15 = vsyncpa [#allocation6 + $0x1], 0  ;;  %s1566_s15 = smov 0   ;;  %s1568_s16 = smov 0  }
   0x4   :  { %s1570_s17 = smov 0   ;;  %s1572_s18 = smov 0  }
   0x5   :  { %s1574_s19 = smov 0   ;;  %s1576_s20 = smov 0  }
   0x6 LB: > { %s1050_s21 = sadd.s32 4294967295, %s1533_s20   ;;  %s1051_s22 = sadd.s32 4294967294, %s1533_s20   ;;  %s1533_s20 = sphi %s1576_s20, %s21_s20   ;;  %s1529_s19 = sphi %s1574_s19, %s2106_s19   ;;  %s1525_s18 = sphi %s1572_s18, %s2105_s18   ;;  %s1521_s17 = sphi %s1570_s17, %s2104_s17   ;;  %s1517_s16 = sphi %s1568_s16, %s2103_s16   ;;  %s1513_s15 = sphi %s1566_s15, %s2102_s15  }
   0x7   : > { %s33_s23 = sadd.s32 1, %s1529_s19  ;;  %s123_s24 = sadd.s32 1, %s1521_s17 }
   0x8   : > { %p35_p0 = scmp.ge.s32.totalorder %s33_s23, 4  ;;  %p133_p1 = scmp.ne.s32.totalorder %s1521_s17, %s1517_s16 }
   0x9   : > { %p134_p2 = scmp.eq.s32.totalorder %s1050_s21, 3  ;;  %p139_p3 = scmp.ne.s32.totalorder %s1517_s16, %s1513_s15 }
   0xa   : > { %s2108_s23 = smov (%p35_p0, %s33_s23), 0  ;;  %p140_p5 = scmp.eq.s32.totalorder %s1051_s22, 3 }
   0xb   : > { %p1606_p4 = por %p134_p2, %p133_p1  ;;  %s118_s26 = ssub.s32 %s1529_s19, %s2108_s23 }
   0xc   : > { %p1054_p6 = scmp.ge.s32.totalorder %s1533_s20, 1  ;;  %p121_p7 = scmp.eq.s32.totalorder %s118_s26, 0 }
   0xd   : > { %p1613_p8 = por %p140_p5, %p139_p3  ;;  %p225_p9 = scmp.lt.s32.totalorder %s1533_s20, 5 }
   0xe   : > { %s1619_s28 = scalar_select %p121_p7, %s1521_s17, %s123_s24  }
   0xf   : > { %p226_p10 = pnand %p1054_p6, %p225_p9 }
  0x10   : > { %p279_p11 = scmp.lt.s32.totalorder (!%p226_p10), %s1525_s18, 3  ;;  %vm320_vm0 = vcmask (!%p226_p10), 130048   ;;  %v1057_v0 = vld [vmem:[%s2083_s2 + $0x30] sm:$0xff] (!%p226_p10)  ;;  %v339_v1 = vld [vmem:[%s2083_s2] sm:$0xff] (!%p226_p10)  ;;  %s1870_s30 = sand.u32 (!%p226_p10), 1, %s1517_s16  }
  0x11   : > { %229 = sbr.rel (%p226_p10) target bundleno = 424 (0x1a8), region = 32  ;;  %1189 = vmatprep.mubr.msk.f32.mxu1 (!%p226_p10), %vm320_vm0, %v1057_v0  ;;  %1230 = vmatprep.mubr.msk.f32.mxu0 (!%p226_p10), %vm320_vm0, %v339_v1  ;;  %vm1677_vm1 = vmpackc.low (!%p226_p10), %vm320_vm0, %vm320_vm0  ;;  %s1535_s14 = smov (!%p226_p10), [#allocation3]  }
  0x12   : > { %s1341_s5 = smul.u32 (!%p226_p10), 24, %s1870_s30 }
  0x14   : > { %s1902_s6 = scalar_lea.vmem (!%p226_p10), [#allocation3], %s1341_s5 }
  0x18   : > { %s280_s7 = scalar_select %p279_p11, %s1525_s18, 3 }
  0x1a   : > { %s1342_s8 = smul.u32 136, %s280_s7 }
  0x1b   : > { %s1344_s7 = smul.u32 384, %s1525_s18 }
  0x1c   : > { %s1634_s11 = scalar_lea.vmem %s2081_s0, %s1342_s8  ;;  %s1636_s12 = sadd.s32 128, %s1342_s8 }
  0x1d   : > { %v304_v2 = vld [vmem:[%s1634_s11] sm:$0xff]  ;;  %v305_v3 = vld [vmem:[%s1634_s11 + $0x8] sm:$0xff]  ;;  %v306_v4 = vld [vmem:[%s1634_s11 + $0x10] sm:$0xff]  ;;  %s301_s21 = scalar_lea.vmem %s2082_s1, %s1636_s12  ;;  %s903_s8 = sshll.u32 %s1902_s6, 4  ;;  %s1926_s8 = int_to_ptr.vmem [resolvable:$true] %s903_s8 }
  0x1e   : > { %321 = vst.msk [vmem:[#allocation2] sm:$0xff] %vm320_vm0, %v304_v2  ;;  %322 = vst.msk [vmem:[#allocation2 + $0x8] sm:$0xff] %vm320_vm0, %v305_v3  ;;  %v307_v5 = vld [vmem:[%s1634_s11 + $0x18] sm:$0xff]  ;;  %v308_v6 = vld [vmem:[%s1634_s11 + $0x20] sm:$0xff]  ;;  %s884_s12 = scalar_lea.sflag [#allocation4], %s1870_s30  ;;  %s1423_s13 = scalar_lea.vmem %s1926_s8, 384 }
  0x1f   : > { %323 = vst.msk [vmem:[#allocation2 + $0x10] sm:$0xff] %vm320_vm0, %v306_v4  ;;  %v309_v7 = vld [vmem:[%s1634_s11 + $0x28] sm:$0xff]  ;;  %324 = vst.msk [vmem:[#allocation2 + $0x18] sm:$0xff] %vm320_vm0, %v307_v5  ;;  %v310_v8 = vld [vmem:[%s1634_s11 + $0x30] sm:$0xff]  ;;  %p1424_p12 = scmp.ne.s32.totalorder %s1926_s8, %s1423_s13 }
  0x20   : > { %325 = vst.msk [vmem:[#allocation2 + $0x20] sm:$0xff] %vm320_vm0, %v308_v6  ;;  %326 = vst.msk [vmem:[#allocation2 + $0x28] sm:$0xff] %vm320_vm0, %v309_v7  ;;  %v311_v9 = vld [vmem:[%s1634_s11 + $0x38] sm:$0xff]  ;;  %v312_v10 = vld [vmem:[%s1634_s11 + $0x40] sm:$0xff] }
  0x21   : > { %327 = vst.msk [vmem:[#allocation2 + $0x30] sm:$0xff] %vm320_vm0, %v310_v8  ;;  %328 = vst.msk [vmem:[#allocation2 + $0x38] sm:$0xff] %vm320_vm0, %v311_v9  ;;  %v313_v11 = vld [vmem:[%s1634_s11 + $0x48] sm:$0xff]  ;;  %v314_v12 = vld [vmem:[%s1634_s11 + $0x50] sm:$0xff]  ;;  %p1425_p13 = pnand %p1424_p12, %p1606_p4 }
  0x22   : > { %329 = vst.msk [vmem:[#allocation2 + $0x40] sm:$0xff] %vm320_vm0, %v312_v10  ;;  %v315_v13 = vld [vmem:[%s1634_s11 + $0x58] sm:$0xff]  ;;  %330 = vst.msk [vmem:[#allocation2 + $0x48] sm:$0xff] %vm320_vm0, %v313_v11  ;;  %v316_v14 = vld [vmem:[%s1634_s11 + $0x60] sm:$0xff] }
  0x23   : > { %331 = vst.msk [vmem:[#allocation2 + $0x50] sm:$0xff] %vm320_vm0, %v314_v12  ;;  %332 = vst.msk [vmem:[#allocation2 + $0x58] sm:$0xff] %vm320_vm0, %v315_v13  ;;  %v317_v15 = vld [vmem:[%s1634_s11 + $0x68] sm:$0xff]  ;;  %v318_v16 = vld [vmem:[%s1634_s11 + $0x70] sm:$0xff]  ;;  %p1426_p0 = pneg %p1425_p13 }
  0x24   : > { %333 = vst.msk [vmem:[#allocation2 + $0x60] sm:$0xff] %vm320_vm0, %v316_v14  ;;  %334 = vst.msk [vmem:[#allocation2 + $0x68] sm:$0xff] %vm320_vm0, %v317_v15  ;;  %v319_v17 = vld [vmem:[%s1634_s11 + $0x78] sm:$0xff]  ;;  %v337_v18 = vld [vmem:[%s301_s21] sm:$0xff]  ;;  %s1922_s11 = scalar_lea.hbm %s2084_s3, %s1344_s7  ;;  %s1427_s21 = sshll.u32 %s1535_s14, 4  ;;  %s1428_s21 = int_to_ptr.vmem [resolvable:$false] %s1427_s21 }
  0x25   : > { %335 = vst.msk [vmem:[#allocation2 + $0x70] sm:$0xff] %vm320_vm0, %v318_v16  ;;  %336 = vst.msk [vmem:[#allocation2 + $0x78] sm:$0xff] %vm320_vm0, %v319_v17  ;;  %v368_v20 = vld [vmem:[#allocation2 + $0x1] sm:$0xff]  ;;  %v1058_v4 = vld [vmem:[%s2083_s2 + $0x38] sm:$0xff]  ;;  %s1429_s22 = scalar_lea.vmem %s1428_s21, 768  ;;  %p1430_p1 = scmp.lt.s32.totalorder %s1926_s8, %s1428_s21 }
  0x26   : > { %338 = vst.msk [vmem:[#allocation2 + $0x80] sm:$0xff] %vm320_vm0, %v337_v18  ;;  %v369_v21 = vld [vmem:[#allocation2 + $0x9] sm:$0xff]  ;;  %v345_v22 = vld [vmem:[#allocation2] sm:$0xff]  ;;  %v370_v25 = vld [vmem:[#allocation2 + $0x11] sm:$0xff]  ;;  %p1431_p2 = scmp.lt.s32.totalorder %s1429_s22, %s1423_s13 }
  0x27   : > { %v1239_v23 = vpack.c.bf16 %v369_v21, %v368_v20  ;;  %v346_v24 = vld [vmem:[#allocation2 + $0x8] sm:$0xff]  ;;  %v371_v26 = vld [vmem:[#allocation2 + $0x19] sm:$0xff]  ;;  %v347_v29 = vld [vmem:[#allocation2 + $0x10] sm:$0xff] }
  0x28   : > { %v1287_v27 = vpack.c.bf16 %v346_v24, %v345_v22  ;;  %v1245_v28 = vpack.c.bf16 %v371_v26, %v370_v25  ;;  %v348_v30 = vld [vmem:[#allocation2 + $0x18] sm:$0xff]  ;;  %v372_v32 = vld [vmem:[#allocation2 + $0x21] sm:$0xff]  ;;  %v373_v33 = vld [vmem:[#allocation2 + $0x29] sm:$0xff]  ;;  %p1432_p3 = por %p1431_p2, %p1430_p1 }
  0x29   : > { %1241 = vmatprep.subr.msk.bf16.mxu1 %vm1677_vm1, %v1239_v23  ;;  %v1293_v31 = vpack.c.bf16 %v348_v30, %v347_v29  ;;  %v349_v34 = vld [vmem:[#allocation2 + $0x20] sm:$0xff]  ;;  %v350_v35 = vld [vmem:[#allocation2 + $0x28] sm:$0xff]  ;;  %v1251_v36 = vpack.c.bf16 %v373_v33, %v372_v32  ;;  %v374_v38 = vld [vmem:[#allocation2 + $0x31] sm:$0xff] }
  0x2a   : > { %1289 = vmatprep.subr.msk.bf16.mxu0 %vm1677_vm1, %v1287_v27  ;;  %1244 = vmatpush3.bf16.xpose.msk.msra.mxu1 %vm1677_vm1, %v1239_v23  ;;  %v1299_v37 = vpack.c.bf16 %v350_v35, %v349_v34  ;;  %v375_v39 = vld [vmem:[#allocation2 + $0x39] sm:$0xff]  ;;  %v351_v40 = vld [vmem:[#allocation2 + $0x30] sm:$0xff]  ;;  %v376_v44 = vld [vmem:[#allocation2 + $0x41] sm:$0xff]  ;;  %p1433_p5 = pnand %p1432_p3, %p1426_p0 }
  0x2b   : > { %1292 = vmatpush3.bf16.xpose.msk.msra.mxu0 %vm1677_vm1, %v1287_v27  ;;  %1247 = vmatprep.subr.msk.bf16.mxu1 %vm1677_vm1, %v1245_v28  ;;  %v352_v41 = vld [vmem:[#allocation2 + $0x38] sm:$0xff]  ;;  %v1257_v42 = vpack.c.bf16 %v375_v39, %v374_v38  ;;  %v377_v45 = vld [vmem:[#allocation2 + $0x49] sm:$0xff]  ;;  %v353_v46 = vld [vmem:[#allocation2 + $0x40] sm:$0xff] }
  0x2c   : > { %1295 = vmatprep.subr.msk.bf16.mxu0 %vm1677_vm1, %v1293_v31  ;;  %v1305_v43 = vpack.c.bf16 %v352_v41, %v351_v40  ;;  %v354_v47 = vld [vmem:[#allocation2 + $0x48] sm:$0xff]  ;;  %v1263_v48 = vpack.c.bf16 %v377_v45, %v376_v44  ;;  %v378_v50 = vld [vmem:[#allocation2 + $0x51] sm:$0xff]  ;;  %v379_v51 = vld [vmem:[#allocation2 + $0x59] sm:$0xff] }
  0x2d   : > { %v1311_v49 = vpack.c.bf16 %v354_v47, %v353_v46  ;;  %v355_v52 = vld [vmem:[#allocation2 + $0x50] sm:$0xff]  ;;  %v356_v53 = vld [vmem:[#allocation2 + $0x58] sm:$0xff]  ;;  %v1269_v54 = vpack.c.bf16 %v379_v51, %v378_v50  ;;  %v380_v56 = vld [vmem:[#allocation2 + $0x61] sm:$0xff] }
  0x2e   : > { %v1317_v55 = vpack.c.bf16 %v356_v53, %v355_v52  ;;  %v381_v57 = vld [vmem:[#allocation2 + $0x69] sm:$0xff]  ;;  %v357_v58 = vld [vmem:[#allocation2 + $0x60] sm:$0xff]  ;;  %v382_v62 = vld [vmem:[#allocation2 + $0x71] sm:$0xff] }
  0x2f   : > { %v358_v59 = vld [vmem:[#allocation2 + $0x68] sm:$0xff]  ;;  %v1275_v60 = vpack.c.bf16 %v381_v57, %v380_v56  ;;  %v383_v63 = vld [vmem:[#allocation2 + $0x79] sm:$0xff]  ;;  %v359_v0 = vld [vmem:[#allocation2 + $0x70] sm:$0xff] }
  0x30   : > { %v1323_v61 = vpack.c.bf16 %v358_v59, %v357_v58  ;;  %v360_v1 = vld [vmem:[#allocation2 + $0x78] sm:$0xff]  ;;  %v1281_v2 = vpack.c.bf16 %v383_v63, %v382_v62  ;;  %v340_v5 = vld [vmem:[%s2083_s2 + $0x8] sm:$0xff]  ;;  %v1059_v6 = vld [vmem:[%s2083_s2 + $0x40] sm:$0xff] }
  0x31   : > { %v1329_v3 = vpack.c.bf16 %v360_v1, %v359_v0  ;;  %v341_v7 = vld [vmem:[%s2083_s2 + $0x10] sm:$0xff]  ;;  %v1060_v8 = vld [vmem:[%s2083_s2 + $0x48] sm:$0xff]  ;;  %v342_v9 = vld [vmem:[%s2083_s2 + $0x18] sm:$0xff] }
  0x32   : > { %1250 = vmatpush3.bf16.xpose.msk.msra.mxu1 %vm1677_vm1, %v1245_v28  ;;  %v1061_v10 = vld [vmem:[%s2083_s2 + $0x50] sm:$0xff]  ;;  %v343_v11 = vld [vmem:[%s2083_s2 + $0x20] sm:$0xff]  ;;  %v1062_v12 = vld [vmem:[%s2083_s2 + $0x58] sm:$0xff] }
  0x33   : > { %1298 = vmatpush3.bf16.xpose.msk.msra.mxu0 %vm1677_vm1, %v1293_v31  ;;  %1253 = vmatprep.subr.msk.bf16.mxu1 %vm1677_vm1, %v1251_v36  ;;  %v344_v13 = vld [vmem:[%s2083_s2 + $0x28] sm:$0xff] }
  0x34   : > { %1301 = vmatprep.subr.msk.bf16.mxu0 %vm1677_vm1, %v1299_v37 }
  0x3a   : > { %1256 = vmatpush3.bf16.xpose.msk.msra.mxu1 %vm1677_vm1, %v1251_v36 }
  0x3b   : > { %1304 = vmatpush3.bf16.xpose.msk.msra.mxu0 %vm1677_vm1, %v1299_v37  ;;  %1259 = vmatprep.subr.msk.bf16.mxu1 %vm1677_vm1, %v1257_v42 }
  0x3c   : > { %1307 = vmatprep.subr.msk.bf16.mxu0 %vm1677_vm1, %v1305_v43 }
  0x42   : > { %1262 = vmatpush3.bf16.xpose.msk.msra.mxu1 %vm1677_vm1, %v1257_v42 }
  0x43   : > { %1310 = vmatpush3.bf16.xpose.msk.msra.mxu0 %vm1677_vm1, %v1305_v43  ;;  %1265 = vmatprep.subr.msk.bf16.mxu1 %vm1677_vm1, %v1263_v48 }
  0x44   : > { %1313 = vmatprep.subr.msk.bf16.mxu0 %vm1677_vm1, %v1311_v49 }
  0x4a   : > { %1268 = vmatpush3.bf16.xpose.msk.msra.mxu1 %vm1677_vm1, %v1263_v48 }
  0x4b   : > { %1316 = vmatpush3.bf16.xpose.msk.msra.mxu0 %vm1677_vm1, %v1311_v49  ;;  %1271 = vmatprep.subr.msk.bf16.mxu1 %vm1677_vm1, %v1269_v54 }
  0x4c   : > { %1319 = vmatprep.subr.msk.bf16.mxu0 %vm1677_vm1, %v1317_v55 }
  0x52   : > { %1274 = vmatpush3.bf16.xpose.msk.msra.mxu1 %vm1677_vm1, %v1269_v54 }
  0x53   : > { %1322 = vmatpush3.bf16.xpose.msk.msra.mxu0 %vm1677_vm1, %v1317_v55  ;;  %1277 = vmatprep.subr.msk.bf16.mxu1 %vm1677_vm1, %v1275_v60 }
  0x54   : > { %1325 = vmatprep.subr.msk.bf16.mxu0 %vm1677_vm1, %v1323_v61 }
  0x5a   : > { %1280 = vmatpush3.bf16.xpose.msk.msra.mxu1 %vm1677_vm1, %v1275_v60 }
  0x5b   : > { %1328 = vmatpush3.bf16.xpose.msk.msra.mxu0 %vm1677_vm1, %v1323_v61  ;;  %1283 = vmatprep.subr.msk.bf16.mxu1 %vm1677_vm1, %v1281_v2 }
  0x5c   : > { %1331 = vmatprep.subr.msk.bf16.mxu0 %vm1677_vm1, %v1329_v3 }
  0x62   : > { %1286 = vmatpush3.bf16.xpose.msk.msra.mxu1 %vm1677_vm1, %v1281_v2 }
  0x63   : > { %1334 = vmatpush3.bf16.xpose.msk.msra.mxu0 %vm1677_vm1, %v1329_v3 }
  0x69   : > { %1190 = vmatmul.mubr.msk.f32.vlgmr.msra.gmra.mrb[0].mxu1 %vm320_vm0, %v1058_v4 }
  0x6a   : > { %1231 = vmatmul.mubr.msk.f32.vlgmr.msra.gmra.mrb[0].mxu0 %vm320_vm0, %v340_v5  ;;  %1192 = vmatprep.mubr.msk.f32.mxu1 %vm320_vm0, %v1059_v6 }
  0x6b   : > { %1233 = vmatprep.mubr.msk.f32.mxu0 %vm320_vm0, %v341_v7 }
  0x6d   : > { %1193 = vmatmul.mubr.msk.f32.gmra.mrb[2].mxu1 %vm320_vm0, %v1060_v8 }
  0x6e   : > { %1234 = vmatmul.mubr.msk.f32.gmra.mrb[2].mxu0 %vm320_vm0, %v342_v9  ;;  %1195 = vmatprep.mubr.msk.f32.mxu1 %vm320_vm0, %v1061_v10 }
  0x6f   : > { %1236 = vmatprep.mubr.msk.f32.mxu0 %vm320_vm0, %v343_v11 }
  0x71   : > { %1196 = vmatmul.mubr.msk.f32.gmra.mrb[4].mxu1 %vm320_vm0, %v1062_v12 }
  0x72   : > { %1237 = vmatmul.mubr.msk.f32.gmra.mrb[4].mxu0 %vm320_vm0, %v344_v13 }
 0x13c   : > { %v1191_v14 = vpop.f32.mrb[0].mxu1 }
 0x13d   : > { %v1232_v15 = vpop.f32.mrb[0].mxu0  ;;  %v516_v16 = vpop.f32.mrb[1].mxu1 }
 0x13e   : > { %v1785_v17 = vadd.f32 %v1232_v15, %v1191_v14  ;;  %v677_v18 = vpop.f32.mrb[1].mxu0 }
 0x13f   : > { %v1787_v19 = vadd.f32 %v677_v18, %v516_v16 }
 0x140   : > { %v1194_v20 = vpop.f32.mrb[2].mxu1  ;;  %v707_v39 = vmul.f32 %v1785_v17, %v1785_v17  ;;  %v1831_v42 = vand.u32 2147483647, %v1785_v17  ;;  %vm820_vm11 = vcmp.ne.f32.partialorder %v1785_v17, %v1785_v17 }
 0x141   : > { %v1235_v21 = vpop.f32.mrb[2].mxu0  ;;  %v526_v22 = vpop.f32.mrb[3].mxu1  ;;  %v706_v26 = vmul.f32 %v1787_v19, %v1787_v19  ;;  %v1796_v27 = vand.u32 2147483647, %v1787_v19  ;;  %vm773_vm2 = vcmp.ne.f32.partialorder %v1787_v19, %v1787_v19 }
 0x142   : > { %v687_v23 = vpop.f32.mrb[3].mxu0  ;;  %v1789_v24 = vadd.f32 %v1235_v21, %v1194_v20 }
 0x143   : > { %v1791_v25 = vadd.f32 %v687_v23, %v526_v22  ;;  %vm779_vm6 = vcmp.eq.s32.totalorder %v1796_v27, inf }
 0x144   : > { %v1197_v28 = vpop.f32.mrb[4].mxu1  ;;  %v709_v29 = vmul.f32 %v1789_v24, %v1789_v24  ;;  %v1803_v30 = vand.u32 2147483647, %v1789_v24  ;;  %vm774_vm3 = vcmp.ne.f32.partialorder %v1789_v24, %v1789_v24 }
 0x145   : > { %v1238_v31 = vpop.f32.mrb[4].mxu0  ;;  %v536_v32 = vpop.f32.mrb[5].mxu1  ;;  %vm1807_vm4 = vmor %vm773_vm2, %vm774_vm3  ;;  %v1820_v38 = vand.u32 2147483647, %v1791_v25  ;;  %v708_v43 = vmul.f32 %v1791_v25, %v1791_v25  ;;  %vm867_vm9 = vcmp.ne.f32.partialorder %v1791_v25, %v1791_v25 }
 0x146   : > { %v697_v34 = vpop.f32.mrb[5].mxu0  ;;  %v712_v35 = vadd.f32 %v709_v29, %v706_v26  ;;  %v741_v36 = vmin.f32 %v1796_v27, %v1803_v30  ;;  %v742_v37 = vmax.f32 %v1796_v27, %v1803_v30  ;;  %vm763_vm5 = vcmp.gt.f32.partialorder %v1803_v30, %v1796_v27 }
 0x147   : > { %vm780_vm7 = vcmp.eq.s32.totalorder %v1803_v30, inf  ;;  %v1828_v41 = vadd.f32 %v1238_v31, %v1197_v28  ;;  %v1835_v44 = vadd.f32 %v697_v34, %v536_v32  ;;  %vm873_vm13 = vcmp.eq.s32.totalorder %v1820_v38, inf }
 0x148   : > { %1411 = vrsqrt.f32 %v712_v35  ;;  %vm1824_vm8 = vmand %vm779_vm6, %vm780_vm7  ;;  %vm826_vm7 = vcmp.eq.s32.totalorder %v1831_v42, inf  ;;  %v720_v63 = vand.u32 2147483648, %v712_v35 }
 0x149   : > { %1413 = vrcp.f32 %v742_v37  ;;  %v711_v45 = vmul.f32 %v1828_v41, %v1828_v41  ;;  %v1842_v46 = vand.u32 2147483647, %v1828_v41  ;;  %vm868_vm10 = vcmp.ne.f32.partialorder %v1828_v41, %v1828_v41 }
 0x14a   : > { %vm1848_vm12 = vmor %vm867_vm9, %vm868_vm10  ;;  %v710_v48 = vmul.f32 %v1835_v44, %v1835_v44  ;;  %v1856_v49 = vand.u32 2147483647, %v1835_v44  ;;  %vm821_vm2 = vcmp.ne.f32.partialorder %v1835_v44, %v1835_v44  ;;  %vm717_vm10 = vcmp.eq.f32.partialorder %v712_v35, inf }
 0x14b   : > { %v714_v50 = vadd.f32 %v711_v45, %v708_v43  ;;  %v835_v51 = vmin.f32 %v1820_v38, %v1842_v46  ;;  %v836_v52 = vmax.f32 %v1820_v38, %v1842_v46  ;;  %vm857_vm14 = vcmp.gt.f32.partialorder %v1842_v46, %v1820_v38  ;;  %vm1884_vm6 = vmor %vm820_vm11, %vm821_vm2 }
 0x14c   : > { %vm874_vm15 = vcmp.eq.s32.totalorder %v1842_v46, inf  ;;  %v713_v53 = vadd.f32 %v710_v48, %v707_v39  ;;  %v788_v54 = vmin.f32 %v1831_v42, %v1856_v49  ;;  %v789_v55 = vmax.f32 %v1831_v42, %v1856_v49 }
 0x14d   : > { %1415 = vrsqrt.f32 %v714_v50  ;;  %vm1872_vm0 = vmand %vm873_vm13, %vm874_vm15  ;;  %vm810_vm1 = vcmp.gt.f32.partialorder %v1856_v49, %v1831_v42  ;;  %vm827_vm3 = vcmp.eq.s32.totalorder %v1856_v49, inf  ;;  %vm719_vm11 = vcmp.eq.f32.partialorder %v712_v35, 0.0 }
 0x14e   : > { %1417 = vrcp.f32 %v836_v52  ;;  %vm1889_vm9 = vmand %vm826_vm7, %vm827_vm3  ;;  %vm724_vm13 = vcmp.eq.f32.partialorder %v713_v53, inf  ;;  %vm731_vm15 = vcmp.eq.f32.partialorder %v714_v50, inf  ;;  %v734_v10 = vand.u32 2147483648, %v714_v50 }
 0x14f   : > { %1419 = vrsqrt.f32 %v713_v53  ;;  %v727_v13 = vand.u32 2147483648, %v713_v53  ;;  %vm733_vm2 = vcmp.eq.f32.partialorder %v714_v50, 0.0  ;;  %vm726_vm3 = vcmp.eq.f32.partialorder %v713_v53, 0.0 }
 0x150   : > { %1421 = vrcp.f32 %v789_v55 }
 0x152   : > { %v1412_v59 = vpop.eup %1411 }
 0x153   : > { %v1414_v60 = vpop.eup %1413  ;;  %v716_v61 = vmul.f32 %v1412_v59, %v712_v35 }
 0x154   : > { %v1894_v62 = vmul.f32 %v1414_v60, %v741_v36 }
 0x155   : > { %v718_v0 = vsel %vm717_vm10, %v712_v35, %v716_v61 }
 0x156   : > { %v1898_v1 = vmul.f32 %v1894_v62, %v1894_v62  ;;  %v721_v2 = vsel %vm719_vm11, %v720_v63, %v718_v0 }
 0x157   : > { %736 = vst [vmem:[%s1902_s6] sm:$0xff] %v721_v2  ;;  %v1416_v3 = vpop.eup %1415 }
 0x158   : > { %v746_v4 = vmul.f32 0.002785687, %v1898_v1  ;;  %v1418_v5 = vpop.eup %1417  ;;  %v730_v6 = vmul.f32 %v1416_v3, %v714_v50 }
 0x159   : > { %v1420_v7 = vpop.eup %1419  ;;  %v1907_v9 = vmul.f32 %v1418_v5, %v835_v51 }
 0x15a   : > { %v747_v8 = vadd.f32 -0.015866, %v746_v4  ;;  %v1422_v11 = vpop.eup %1421  ;;  %v723_v12 = vmul.f32 %v1420_v7, %v713_v53  ;;  %v732_v14 = vsel %vm731_vm15, %v714_v50, %v730_v6 }
 0x15b   : > { %v1913_v16 = vmul.f32 %v1907_v9, %v1907_v9  ;;  %v1915_v18 = vmul.f32 %v1422_v11, %v788_v54  ;;  %v735_v20 = vsel %vm733_vm2, %v734_v10, %v732_v14 }
 0x15c   : > { %v748_v15 = vmul.f32 %v747_v8, %v1898_v1  ;;  %v725_v21 = vsel %vm724_vm13, %v713_v53, %v723_v12  ;;  %738 = vst [vmem:[%s1902_s6 + $0x10] sm:$0xff] %v735_v20 }
 0x15d   : > { %v840_v23 = vmul.f32 0.002785687, %v1913_v16  ;;  %v1931_v26 = vmul.f32 %v1915_v18, %v1915_v18  ;;  %v728_v28 = vsel %vm726_vm3, %v727_v13, %v725_v21 }
 0x15e   : > { %v749_v22 = vadd.f32 0.04247222, %v748_v15  ;;  %737 = vst [vmem:[%s1902_s6 + $0x8] sm:$0xff] %v728_v28 }
 0x15f   : > { %v841_v31 = vadd.f32 -0.015866, %v840_v23  ;;  %v793_v32 = vmul.f32 0.002785687, %v1931_v26 }
 0x160   : > { %v750_v29 = vmul.f32 %v749_v22, %v1898_v1 }
 0x161   : > { %1436 = shalt.err (!%p1433_p5)
}
 0x162   : > { %s1437_s24 = scalar_lea.hbm %s1922_s11, 384  ;;  %s1441_s6 = scalar_lea.hbm %s2084_s3, 1536 }
 0x163   : > { %p1438_p6 = scmp.ne.s32.totalorder %s1922_s11, %s1437_s24  ;;  %p1442_p10 = scmp.lt.u32.totalorder %s1922_s11, %s2084_s3 }
 0x164   : > { %p1443_p11 = scmp.lt.u32.totalorder %s1441_s6, %s1437_s24  ;;  %p1445_p13 = scmp.lt.u32.totalorder %s1437_s24, %s1922_s11 }
 0x165   : > { %p1439_p7 = pnand %p1438_p6, %p1606_p4 }
 0x166   : > { %p1444_p12 = por %p1443_p11, %p1442_p10 }
 0x167   : > { %p1440_p9 = pneg %p1439_p7 }
 0x168   : > { %p1446_p0 = por %p1445_p13, %p1444_p12 }
 0x16a   : > { %p1447_p1 = pnand %p1446_p0, %p1440_p9 }
 0x16c   : > { %1450 = shalt.err (!%p1447_p1)
}
 0x16d   : > { %s1536_s13 = smov 128   ;;  %s1537_s14 = smov 8   ;;  %v751_v34 = vadd.f32 -0.074975304, %v750_v29  ;;  %v842_v35 = vmul.f32 %v841_v31, %v1913_v16  ;;  %v794_v36 = vadd.f32 -0.015866, %v793_v32 }
 0x16e   : > { %1346 = dma.vmem_to_hbm [thread:$0]  (%p1606_p4), %s1926_s8, 384, %s1922_s11, %s884_s12, %s1536_s13, %s1536_s13, %s1537_s14   ;;  %vm769_vm7 = vcmp.lt.s32.totalorder %v1787_v19, 0  ;;  %vm766_vm10 = vcmp.lt.f32.partialorder %v1787_v19, 0.0  ;;  %vm771_vm11 = vcmp.eq.f32.partialorder %v1789_v24, 0.0  ;;  %v1539_v30 = vmov 0.7853982  }
 0x16f   : > { %v752_v37 = vmul.f32 %v751_v34, %v1898_v1  ;;  %v843_v39 = vadd.f32 0.04247222, %v842_v35  ;;  %v795_v43 = vmul.f32 %v794_v36, %v1931_v26  ;;  %vm816_vm13 = vcmp.lt.s32.totalorder %v1785_v17, 0  ;;  %s273_s8 = scalar_lea.vmem [#allocation5], %s1341_s5  ;;  %s2028_s21 = scalar_lea.hbm %s2085_s4, %s1344_s7 }
 0x170   : > { %vm860_vm15 = vcmp.lt.f32.partialorder %v1791_v25, 0.0  ;;  %s920_s11 = sshll.u32 %s273_s8, 4  ;;  %s889_s22 = scalar_lea.sflag [#allocation6], %s1870_s30  ;;  %s2030_s11 = int_to_ptr.vmem [resolvable:$true] %s920_s11 }
 0x171   : > { %v753_v45 = vadd.f32 0.1064488, %v752_v37  ;;  %v844_v48 = vmul.f32 %v843_v39, %v1913_v16  ;;  %v796_v50 = vadd.f32 0.04247222, %v795_v43  ;;  %v1538_v37 = vmov 0.0   ;;  %s1451_s24 = scalar_lea.vmem %s2030_s11, 384 }
 0x172   : > { %v817_v46 = vsel %vm816_vm13, 3.1415927, %v1538_v37  ;;  %p1452_p2 = scmp.ne.s32.totalorder %s2030_s11, %s1451_s24  ;;  %s1540_s26 = smov [#allocation5]  }
 0x173   : > { %v754_v51 = vmul.f32 %v753_v45, %v1898_v1  ;;  %v845_v52 = vadd.f32 -0.074975304, %v844_v48  ;;  %v797_v53 = vmul.f32 %v796_v50, %v1931_v26  ;;  %v778_v48 = vsel %vm766_vm10, 2.3561945, %v1539_v30  ;;  %s1455_s29 = sshll.u32 %s1540_s26, 4  ;;  %s1456_s29 = int_to_ptr.vmem [resolvable:$false] %s1455_s29 }
 0x174   : > { %p1453_p3 = pnand %p1452_p2, %p1606_p4  ;;  %s1457_s18 = scalar_lea.vmem %s1456_s29, 768 }
 0x175   : > { %v755_v54 = vadd.f32 -0.14207031, %v754_v51  ;;  %v846_v55 = vmul.f32 %v845_v52, %v1913_v16  ;;  %v798_v59 = vadd.f32 -0.074975304, %v797_v53  ;;  %p1458_p6 = scmp.lt.s32.totalorder %s2030_s11, %s1456_s29  ;;  %p1459_p7 = scmp.lt.s32.totalorder %s1457_s18, %s1451_s24 }
 0x176   : > { %p1454_p5 = pneg %p1453_p3 }
 0x177   : > { %v756_v60 = vmul.f32 %v755_v54, %v1898_v1  ;;  %v847_v61 = vadd.f32 0.1064488, %v846_v55  ;;  %v799_v63 = vmul.f32 %v798_v59, %v1931_v26  ;;  %v872_v59 = vsel %vm860_vm15, 2.3561945, %v1539_v30  ;;  %p1460_p9 = por %p1459_p7, %p1458_p6 }
 0x179   : > { %v757_v0 = vadd.f32 0.19993454, %v756_v60  ;;  %v848_v2 = vmul.f32 %v847_v61, %v1913_v16  ;;  %v800_v3 = vadd.f32 0.1064488, %v799_v63  ;;  %v878_v61 = vand.u32 2147483648, %v1828_v41  ;;  %p1461_p10 = pnand %p1460_p9, %p1454_p5 }
 0x17b   : > { %v758_v4 = vmul.f32 %v757_v0, %v1898_v1  ;;  %v849_v5 = vadd.f32 -0.14207031, %v848_v2  ;;  %v801_v6 = vmul.f32 %v800_v3, %v1931_v26  ;;  %v831_v3 = vand.u32 2147483648, %v1835_v44 }
 0x17d   : > { %v759_v7 = vadd.f32 -0.33333147, %v758_v4  ;;  %v850_v8 = vmul.f32 %v849_v5, %v1913_v16  ;;  %v802_v10 = vadd.f32 -0.14207031, %v801_v6 }
 0x17f   : > { %v760_v11 = vmul.f32 %v759_v7, %v1898_v1  ;;  %v851_v12 = vadd.f32 0.19993454, %v850_v8  ;;  %v803_v13 = vmul.f32 %v802_v10, %v1931_v26 }
 0x181   : > { %v761_v14 = vmul.f32 %v760_v11, %v1894_v62  ;;  %v852_v15 = vmul.f32 %v851_v12, %v1913_v16  ;;  %v804_v20 = vadd.f32 0.19993454, %v803_v13 }
 0x183   : > { %v762_v21 = vadd.f32 %v761_v14, %v1894_v62  ;;  %v853_v22 = vadd.f32 -0.33333147, %v852_v15  ;;  %v805_v23 = vmul.f32 %v804_v20, %v1931_v26 }
 0x185   : > { %v764_v28 = vsub.f32 1.5707964, %v762_v21  ;;  %v854_v29 = vmul.f32 %v853_v22, %v1913_v16  ;;  %v806_v31 = vadd.f32 -0.33333147, %v805_v23  ;;  %v770_v16 = vsel %vm769_vm7, 3.1415927, %v1538_v37 }
 0x187   : > { %v765_v1 = vsel %vm763_vm5, %v764_v28, %v762_v21  ;;  %v855_v32 = vmul.f32 %v854_v29, %v1907_v9  ;;  %v807_v34 = vmul.f32 %v806_v31, %v1931_v26  ;;  %vm863_vm5 = vcmp.lt.s32.totalorder %v1791_v25, 0 }
 0x188   : > { %v767_v35 = vsub.f32 3.1415927, %v765_v1  ;;  %v864_v33 = vsel %vm863_vm5, 3.1415927, %v1538_v37 }
 0x189   : > { %v856_v62 = vadd.f32 %v855_v32, %v1907_v9  ;;  %v808_v36 = vmul.f32 %v807_v34, %v1915_v18 }
 0x18a   : > { %v768_v39 = vsel %vm766_vm10, %v767_v35, %v765_v1 }
 0x18b   : > { %v772_v43 = vsel %vm771_vm11, %v770_v16, %v768_v39  ;;  %v858_v45 = vsub.f32 1.5707964, %v856_v62  ;;  %v809_v27 = vadd.f32 %v808_v36, %v1915_v18  ;;  %v784_v18 = vand.u32 2147483648, %v1789_v24 }
 0x18c   : > { %v776_v26 = vsel %vm1807_vm4, nan, %v772_v43  ;;  %vm865_vm4 = vcmp.eq.f32.partialorder %v1828_v41, 0.0 }
 0x18d   : > { %v782_v19 = vsel %vm1824_vm8, %v778_v48, %v776_v26  ;;  %v859_v9 = vsel %vm857_vm14, %v858_v45, %v856_v62  ;;  %v811_v50 = vsub.f32 1.5707964, %v809_v27  ;;  %vm813_vm8 = vcmp.lt.f32.partialorder %v1785_v17, 0.0 }
 0x18e   : > { %v783_v51 = vand.u32 2147483647, %v782_v19  ;;  %v861_v52 = vsub.f32 3.1415927, %v859_v9  ;;  %vm818_vm14 = vcmp.eq.f32.partialorder %v1835_v44, 0.0 }
 0x18f   : > { %v812_v40 = vsel %vm810_vm1, %v811_v50, %v809_v27  ;;  %v825_v49 = vsel %vm813_vm8, 2.3561945, %v1539_v30 }
 0x190   : > { %v785_v53 = vor.u32 %v784_v18, %v783_v51  ;;  %v862_v54 = vsel %vm860_vm15, %v861_v52, %v859_v9  ;;  %v814_v38 = vsub.f32 3.1415927, %v812_v40 }
 0x191   : > { %v866_v55 = vsel %vm865_vm4, %v864_v33, %v862_v54 }
 0x192   : > { %v870_v24 = vsel %vm1848_vm12, nan, %v866_v55  ;;  %v815_v60 = vsel %vm813_vm8, %v814_v38, %v812_v40  ;;  %880 = vst [vmem:[%s273_s8] sm:$0xff] %v785_v53 }
 0x193   : > { %v876_v25 = vsel %vm1872_vm0, %v872_v59, %v870_v24  ;;  %v819_v42 = vsel %vm818_vm14, %v817_v46, %v815_v60 }
 0x194   : > { %v877_v17 = vand.u32 2147483647, %v876_v25  ;;  %v823_v47 = vsel %vm1884_vm6, nan, %v819_v42 }
 0x195   : > { %v829_v63 = vsel %vm1889_vm9, %v825_v49, %v823_v47 }
 0x196   : > { %v879_v0 = vor.u32 %v878_v61, %v877_v17  ;;  %v830_v2 = vand.u32 2147483647, %v829_v63 }
 0x198   : > { %v832_v56 = vor.u32 %v831_v3, %v830_v2  ;;  %882 = vst [vmem:[%s273_s8 + $0x10] sm:$0xff] %v879_v0 }
 0x19a   : > { %881 = vst [vmem:[%s273_s8 + $0x8] sm:$0xff] %v832_v56 }
 0x19b   : > { %1464 = shalt.err (!%p1461_p10)
}
 0x19c   : > { %s1465_s7 = scalar_lea.hbm %s2028_s21, 384  ;;  %s1469_s10 = scalar_lea.hbm %s2085_s4, 1536 }
 0x19d   : > { %p1466_p11 = scmp.ne.s32.totalorder %s2028_s21, %s1465_s7  ;;  %p1470_p0 = scmp.lt.u32.totalorder %s2028_s21, %s2085_s4 }
 0x19e   : > { %p1471_p1 = scmp.lt.u32.totalorder %s1469_s10, %s1465_s7  ;;  %p1473_p3 = scmp.lt.u32.totalorder %s1465_s7, %s2028_s21 }
 0x19f   : > { %p1467_p12 = pnand %p1466_p11, %p1606_p4 }
 0x1a0   : > { %p1472_p2 = por %p1471_p1, %p1470_p0 }
 0x1a1   : > { %p1468_p13 = pneg %p1467_p12 }
 0x1a2   : > { %p1474_p5 = por %p1473_p3, %p1472_p2 }
 0x1a4   : > { %p1475_p6 = pnand %p1474_p5, %p1468_p13 }
 0x1a6   : > { %1478 = shalt.err (!%p1475_p6)
}
 0x1a7   : > { %1347 = dma.vmem_to_hbm [thread:$0]  (%p1606_p4), %s2030_s11, 384, %s2028_s21, %s889_s22, %s1536_s13, %s1536_s13, %s1537_s14  }
 0x1a8 PF: > { %p1358_p7 = scmp.ge.s32.totalorder %s1533_s20, 2  ;;  %s935_s12 = sand.u32 1, %s1513_s15  }
 0x1a9   : > { %s936_s24 = scalar_lea.sflag [#allocation4], %s935_s12 }
 0x1aa   : > { %p1351_p9 = pnand %p1358_p7, %p1613_p8 }
 0x1ac   : > { %1504 = dma.done.wait (!%p1351_p9), %s936_s24, 384  }
 0x1ad   : > { %1506 = vsyncadd (!%p1351_p9), %s936_s24, 4294966912  ;;  %s945_s25 = scalar_lea.sflag [#allocation6], %s935_s12 }
 0x1ae   : > { %1508 = dma.done.wait (!%p1351_p9), %s945_s25, 384  }
 0x1af   : > { %1510 = vsyncadd (!%p1351_p9), %s945_s25, 4294966912  ;;  %s21_s20 = sadd.s32 1, %s1533_s20   ;;  %s2102_s15 = smov %s1517_s16 }
 0x1b0   : > { %p18_p10 = scmp.ge.s32.totalorder %s21_s20, 6   ;;  %s2103_s16 = smov %s1521_s17 }
 0x1b1   : > { %s2104_s17 = smov %s1619_s28  ;;  %s2105_s18 = smov %s1529_s19 }
 0x1b2   : > { %s2106_s19 = smov %s2108_s23  ;;  %20 = sbr.rel (!%p18_p10) target bundleno = 6 (0x6), region = 88 }
 0x1b9   :  { %950 = vsyncpa [#allocation4], 1 }
 0x1ba   :  { %952 = vsyncpa [#allocation4 + $0x1], 1 }
 0x1bb   :  { %953 = vsyncpa [#allocation6], 1 }
 0x1bc   :  { %955 = vsyncpa [#allocation6 + $0x1], 1 }

</bundles_post_ra>
